<compile_context>
chip_gen: v7x
topology: tpu7x:2x2x1
jax: 0.10.0
libtpu: 0.0.40
codegen_flags: <defaults>
</compile_context>

<pallas_src>
import functools

import jax
import jax.numpy as jnp
from jax.experimental import pallas as pl
from jax.experimental.pallas import tpu as pltpu


def actor_mlp_kernel(x_ref, w_ref, b_ref, out_ref):
    """softmax(relu(relu(x@W1+b1)@W2+b2)@W3+b3) for one batch tile.

    w_ref packs [W1; W2; W3(zero-padded cols)] along rows; b_ref packs
    [b1; b2; b3(zero-padded)] as three f32 rows.  Only the first action_dim
    lanes of the W3/b3 views are used, so the padding never affects results.

    NOTE: in a ragged final batch tile the rows past B compute a softmax on
    unspecified data; that is benign because rows never interact and their
    stores are dropped -- do not add any cross-row reduction here.
    """
    s = x_ref.shape[-1]          # state_dim
    h = w_ref.shape[-1]          # hidden_dim
    a = out_ref.shape[-1]        # action_dim

    x = x_ref[...]
    b = b_ref[...]               # (3, h) float32

    # Layer 1: Linear + ReLU (MXU matmul, f32 accumulation).
    h1 = jnp.dot(x, w_ref[pl.ds(0, s), :], preferred_element_type=jnp.float32)
    h1 = jnp.maximum(h1 + b[0:1, :], 0.0).astype(w_ref.dtype)

    # Layer 2: Linear + ReLU.
    h2 = jnp.dot(h1, w_ref[pl.ds(s, h), :], preferred_element_type=jnp.float32)
    h2 = jnp.maximum(h2 + b[1:2, :], 0.0).astype(w_ref.dtype)

    # Layer 3: Linear over the real action lanes only.
    logits = jnp.dot(h2, w_ref[pl.ds(s + h, h), pl.ds(0, a)],
                     preferred_element_type=jnp.float32)
    logits = logits + b[2:3, :a]

    # Numerically stable softmax with an EXACT per-row division (f32).
    m = jnp.max(logits, axis=-1, keepdims=True)
    e = jnp.exp(logits - m)
    denom = jnp.sum(e, axis=-1, keepdims=True)
    out_ref[...] = (e * (1.0 / denom)).astype(out_ref.dtype)


@functools.lru_cache(maxsize=None)
def _num_tensorcores():
    """TensorCores a single Pallas grid can be sharded across (megacore)."""
    try:
        dev = jax.devices()[0]
        if dev.platform != "tpu":
            return 1
        kind = dev.device_kind.lower()
        if any(tag in kind for tag in ("v4", "v5p", "v7", "7x")):
            return 2
    except Exception:
        pass
    return 1


def _choose_batch_tile(B, max_tile, num_cores):
    """Sublane-aligned batch tile.

    Single grid step on 1-TC chips (no point paying ~0.35us/step overhead);
    split ~evenly across TensorCores on megacore parts.  max_tile caps the
    (tb, hidden) f32 intermediates so they stay well inside scoped VMEM.
    """
    max_tile = max(8, (max_tile // 8) * 8)
    if num_cores > 1:
        per_core = -(-B // num_cores)          # ceil(B / num_cores)
        per_core = -(-per_core // 8) * 8       # round up to sublane multiple
        if per_core < B:
            return min(per_core, max_tile)
    return B if B <= max_tile else max_tile


def prepare_params(params, compute_dtype=jnp.bfloat16):
    """One-time packing/casting of actor parameters (keep OUT of the hot loop).

    Returns:
      w_packed: (state_dim + 2*hidden, hidden) in `compute_dtype`,
                rows = [W1; W2; W3 zero-padded to `hidden` columns].
      b_packed: (3, hidden) float32, rows = [b1; b2; b3 zero-padded].
    """
    w1, b1 = params["w1"], params["b1"]
    w2, b2 = params["w2"], params["b2"]
    w3, b3 = params["w3"], params["b3"]
    state_dim, hidden = w1.shape
    action_dim = w3.shape[1]
    assert w2.shape == (hidden, hidden) and w3.shape[0] == hidden
    # TODO(synk): support action_dim > hidden by widening the packed buffers.
    assert action_dim <= hidden
    w3p = jnp.pad(w3, ((0, 0), (0, hidden - action_dim)))
    b3p = jnp.pad(b3, ((0, 0), (0, hidden - action_dim)))
    w_packed = jnp.concatenate([w1, w2, w3p], axis=0).astype(compute_dtype)
    b_packed = jnp.concatenate([b1, b2, b3p], axis=0).astype(jnp.float32)
    return w_packed, b_packed


@functools.partial(jax.jit, static_argnames=("action_dim", "max_batch_tile"))
def actor_forward(state, w_packed, b_packed, *, action_dim, max_batch_tile=2048):
    """state: [B, state_dim]; (w_packed, b_packed) from prepare_params()."""
    B, state_dim = state.shape
    n_rows, hidden = b_packed.shape
    assert n_rows == 3 and w_packed.shape == (state_dim + 2 * hidden, hidden)
    assert action_dim <= hidden

    x = state.astype(w_packed.dtype)   # the only per-call prep op

    tb = _choose_batch_tile(B, max_batch_tile, _num_tensorcores())
    grid = (pl.cdiv(B, tb),)

    # Honest VMEM budget: double-buffered x/out tiles, resident packed params,
    # a few (tb, hidden) f32 intermediates; 2x headroom, capped below the
    # v7x 64 MiB/TC part.
    bpe = w_packed.dtype.itemsize
    est = 2 * tb * state_dim * bpe                      # x tile (double-buffered)
    est += 2 * tb * action_dim * 4                      # out tile (double-buffered)
    est += 2 * w_packed.size * bpe + 2 * b_packed.size * 4
    est += 4 * tb * hidden * 4                          # h1 / h2 / logits / exp
    vmem_limit = int(min(max(2 * est, 8 * 1024 * 1024), 40 * 1024 * 1024))

    return pl.pallas_call(
        actor_mlp_kernel,
        out_shape=jax.ShapeDtypeStruct((B, action_dim), jnp.float32),
        grid_spec=pltpu.PrefetchScalarGridSpec(
            num_scalar_prefetch=0,
            grid=grid,
            in_specs=[
                pl.BlockSpec((tb, state_dim), lambda i: (i, 0)),     # x tile
                pl.BlockSpec(w_packed.shape, lambda i: (0, 0)),      # packed W
                pl.BlockSpec(b_packed.shape, lambda i: (0, 0)),      # packed b
            ],
            out_specs=pl.BlockSpec((tb, action_dim), lambda i: (i, 0)),
        ),
        compiler_params=pltpu.CompilerParams(
            dimension_semantics=("parallel",),
            vmem_limit_bytes=vmem_limit),
    )(x, w_packed, b_packed)


def init_params(key, state_dim, action_dim, hidden_dim=128):
    """Mirror nn.Linear default init (uniform +/- 1/sqrt(fan_in)); W is [in, out]."""
    def linear(k, fan_in, fan_out):
        kw, kb = jax.random.split(k)
        bound = 1.0 / jnp.sqrt(fan_in)
        w = jax.random.uniform(kw, (fan_in, fan_out), jnp.float32, -bound, bound)
        b = jax.random.uniform(kb, (1, fan_out), jnp.float32, -bound, bound)
        return w, b

    k1, k2, k3 = jax.random.split(key, 3)
    w1, b1 = linear(k1, state_dim, hidden_dim)
    w2, b2 = linear(k2, hidden_dim, hidden_dim)
    w3, b3 = linear(k3, hidden_dim, action_dim)
    return {"w1": w1, "b1": b1, "w2": w2, "b2": b2, "w3": w3, "b3": b3}


def actor_forward_ref(state, params):
    """Pure-JAX reference for correctness checking."""
    h = jax.nn.relu(state @ params["w1"] + params["b1"])
    h = jax.nn.relu(h @ params["w2"] + params["b2"])
    logits = h @ params["w3"] + params["b3"]
    return jax.nn.softmax(logits, axis=-1)


if __name__ == "__main__":
    key = jax.random.PRNGKey(0)
    k_state, k_params = jax.random.split(key)

    batch, state_dim, action_dim, hidden_dim = 64, 16, 8, 128

    state = jax.random.normal(k_state, (batch, state_dim), dtype=jnp.float32)
    params = init_params(k_params, state_dim, action_dim, hidden_dim)
    ref = actor_forward_ref(state, params)

    # --- f32 operand path: tight check against the pure-JAX reference ---
    w32, b32 = prepare_params(params, compute_dtype=jnp.float32)
    probs32 = jax.block_until_ready(
        actor_forward(state, w32, b32, action_dim=action_dim))
    assert probs32.shape == (batch, action_dim)
    assert jnp.allclose(jnp.sum(probs32, axis=-1), 1.0, atol=1e-4)
    assert jnp.allclose(probs32, ref, atol=2e-3, rtol=2e-3)

    # --- bf16 operand path (default): rows still sum to 1 exactly (f32 softmax
    #     epilogue); values compared with a deliberately relaxed tolerance ---
    wbf, bbf = prepare_params(params)  # compute_dtype=bfloat16
    probsbf = jax.block_until_ready(
        actor_forward(state, wbf, bbf, action_dim=action_dim))
    assert probsbf.shape == (batch, action_dim)
    assert jnp.allclose(jnp.sum(probsbf, axis=-1), 1.0, atol=1e-4)
    assert jnp.allclose(probsbf, ref, atol=5e-2, rtol=5e-2)

    print("KERNEL_OK")
</pallas_src>

<mosaic_0001>
module attributes {stable_mosaic.version = 11 : i64} {
  func.func @actor_mlp_kernel(%arg0: i32, %arg1: memref<64x16xf32, #tpu.memory_space<vmem>>, %arg2: memref<272x128xf32, #tpu.memory_space<vmem>>, %arg3: memref<3x128xf32, #tpu.memory_space<vmem>>, %arg4: memref<64x8xf32, #tpu.memory_space<vmem>>) attributes {dimension_semantics = [#tpu.dimension_semantics<parallel>], iteration_bounds = array<i64: 1>, scalar_prefetch = 0 : i64, scratch_operands = 0 : i64, tpu.core_type = #tpu.core_type<tc>, window_params = [{transform_indices = @transform_0, window_bounds = array<i64: 64, 16>}, {pipeline_mode = #tpu.pipeline_mode<synchronous>, transform_indices = @transform_1, window_bounds = array<i64: 272, 128>}, {pipeline_mode = #tpu.pipeline_mode<synchronous>, transform_indices = @transform_2, window_bounds = array<i64: 3, 128>}, {transform_indices = @transform_3, window_bounds = array<i64: 64, 8>}]} {
    %c0 = arith.constant 0 : index
    %c0_0 = arith.constant 0 : index
    %0 = vector.load %arg1[%c0, %c0_0] : memref<64x16xf32, #tpu.memory_space<vmem>>, vector<64x16xf32>
    %c0_1 = arith.constant 0 : index
    %c0_2 = arith.constant 0 : index
    %1 = vector.load %arg3[%c0_1, %c0_2] : memref<3x128xf32, #tpu.memory_space<vmem>>, vector<3x128xf32>
    %c0_3 = arith.constant 0 : index
    %c0_4 = arith.constant 0 : index
    %2 = vector.load %arg2[%c0_3, %c0_4] : memref<272x128xf32, #tpu.memory_space<vmem>>, vector<16x128xf32>
    %cst = arith.constant dense<0.000000e+00> : vector<64x128xf32>
    %3 = tpu.matmul %0, %2, %cst {dimension_numbers = #tpu.dot_dimension_numbers<[1], [0], [0], [1], [0, 0, 1, 1], [], []>} : vector<64x16xf32>, vector<16x128xf32>, vector<64x128xf32> -> vector<64x128xf32>
    %4 = vector.extract_strided_slice %1 {offsets = [0, 0], sizes = [1, 128], strides = [1, 1]} : vector<3x128xf32> to vector<1x128xf32>
    %5 = vector.broadcast %4 : vector<1x128xf32> to vector<64x128xf32>
    %6 = arith.addf %3, %5 : vector<64x128xf32>
    %cst_5 = arith.constant 0.000000e+00 : f32
    %7 = vector.broadcast %cst_5 : f32 to vector<64x128xf32>
    %8 = arith.maximumf %6, %7 : vector<64x128xf32>
    %c16 = arith.constant 16 : index
    %c0_6 = arith.constant 0 : index
    %9 = vector.load %arg2[%c16, %c0_6] : memref<272x128xf32, #tpu.memory_space<vmem>>, vector<128x128xf32>
    %cst_7 = arith.constant dense<0.000000e+00> : vector<64x128xf32>
    %10 = tpu.matmul %8, %9, %cst_7 {dimension_numbers = #tpu.dot_dimension_numbers<[1], [0], [0], [1], [0, 0, 1, 1], [], []>} : vector<64x128xf32>, vector<128x128xf32>, vector<64x128xf32> -> vector<64x128xf32>
    %11 = vector.extract_strided_slice %1 {offsets = [1, 0], sizes = [1, 128], strides = [1, 1]} : vector<3x128xf32> to vector<1x128xf32>
    %12 = vector.broadcast %11 : vector<1x128xf32> to vector<64x128xf32>
    %13 = arith.addf %10, %12 : vector<64x128xf32>
    %cst_8 = arith.constant 0.000000e+00 : f32
    %14 = vector.broadcast %cst_8 : f32 to vector<64x128xf32>
    %15 = arith.maximumf %13, %14 : vector<64x128xf32>
    %c144 = arith.constant 144 : index
    %c0_9 = arith.constant 0 : index
    %16 = vector.load %arg2[%c144, %c0_9] : memref<272x128xf32, #tpu.memory_space<vmem>>, vector<128x8xf32>
    %cst_10 = arith.constant dense<0.000000e+00> : vector<64x8xf32>
    %17 = tpu.matmul %15, %16, %cst_10 {dimension_numbers = #tpu.dot_dimension_numbers<[1], [0], [0], [1], [0, 0, 1, 1], [], []>} : vector<64x128xf32>, vector<128x8xf32>, vector<64x8xf32> -> vector<64x8xf32>
    %18 = vector.extract_strided_slice %1 {offsets = [2, 0], sizes = [1, 8], strides = [1, 1]} : vector<3x128xf32> to vector<1x8xf32>
    %19 = vector.broadcast %18 : vector<1x8xf32> to vector<64x8xf32>
    %20 = arith.addf %17, %19 : vector<64x8xf32>
    %cst_11 = arith.constant dense<0xFF800000> : vector<64xf32>
    %21 = vector.multi_reduction <maximumf>, %20, %cst_11 [1] : vector<64x8xf32> to vector<64xf32>
    %22 = vector.shape_cast %21 : vector<64xf32> to vector<64x1xf32>
    %23 = vector.broadcast %22 : vector<64x1xf32> to vector<64x8xf32>
    %24 = arith.subf %20, %23 : vector<64x8xf32>
    %25 = math.exp %24 : vector<64x8xf32>
    %cst_12 = arith.constant dense<0.000000e+00> : vector<64xf32>
    %26 = vector.multi_reduction <add>, %25, %cst_12 [1] : vector<64x8xf32> to vector<64xf32>
    %27 = vector.shape_cast %26 : vector<64xf32> to vector<64x1xf32>
    %cst_13 = arith.constant 1.000000e+00 : f32
    %28 = vector.broadcast %cst_13 : f32 to vector<64x1xf32>
    %29 = arith.divf %28, %27 : vector<64x1xf32>
    %30 = vector.broadcast %29 : vector<64x1xf32> to vector<64x8xf32>
    %31 = arith.mulf %25, %30 : vector<64x8xf32>
    %c0_14 = arith.constant 0 : index
    %c0_15 = arith.constant 0 : index
    %32 = vector.load %arg4[%c0_14, %c0_15] : memref<64x8xf32, #tpu.memory_space<vmem>>, vector<64x8xf32>
    tpu.vector_store %arg4[%c0_14, %c0_15], %31 {strides = array<i32>} : memref<64x8xf32, #tpu.memory_space<vmem>>, vector<64x8xf32>,
    return
  }
  func.func @transform_0(%arg0: i32) -> (i32, i32) {
    %c0_i32 = arith.constant 0 : i32
    %c0_i32_0 = arith.constant 0 : i32
    return %arg0, %c0_i32 : i32, i32
  }
  func.func @transform_1(%arg0: i32) -> (i32, i32) {
    %c0_i32 = arith.constant 0 : i32
    %c0_i32_0 = arith.constant 0 : i32
    %c0_i32_1 = arith.constant 0 : i32
    return %c0_i32, %c0_i32_0 : i32, i32
  }
  func.func @transform_2(%arg0: i32) -> (i32, i32) {
    %c0_i32 = arith.constant 0 : i32
    %c0_i32_0 = arith.constant 0 : i32
    %c0_i32_1 = arith.constant 0 : i32
    return %c0_i32, %c0_i32_0 : i32, i32
  }
  func.func @transform_3(%arg0: i32) -> (i32, i32) {
    %c0_i32 = arith.constant 0 : i32
    %c0_i32_0 = arith.constant 0 : i32
    return %arg0, %c0_i32 : i32, i32
  }
}

</mosaic_0001>

<bundles_post_ra>
// kernel: actor_forward.1
= control target key start
LH: loop header
LB: loop body
LE: loop exit
PB: predicated region body
PF: predicated region fallthrough
CT: control target
= control target key end

     0   :  { %8 = vsyncpa [#allocation3], 0  ;;  %s846_s12 = smov [#allocation2]   ;;  %s974_s0 = inlined_call_operand.vmem [shape: f32[64,16], index: 0, kind: input, shape index: {}]   ;;  %s975_s1 = inlined_call_operand.hbm [shape: f32[272,128], index: 1, kind: input, shape index: {}]   ;;  %s976_s2 = inlined_call_operand.vmem [shape: f32[3,128], index: 2, kind: input, shape index: {}]   ;;  %s977_s3 = inlined_call_operand.vmem [shape: f32[64,8], index: 3, kind: output, shape index: {}]  }
   0x1   :  { %s16_s13 = sshll.u32 %s846_s12, 4  ;;  %s822_s16 = scalar_lea.hbm %s975_s1, 4352  ;;  %s17_s13 = int_to_ptr.vmem [resolvable:$true] %s16_s13 }
   0x2   :  { %p823_p0 = scmp.ne.s32.totalorder %s975_s1, %s822_s16  ;;  %p826_p1 = scmp.lt.u32.totalorder %s822_s16, %s975_s1 }
   0x4   :  { %p828_p2 = pnand %p826_p1, %p823_p0 }
   0x6   :  { %831 = shalt.err (!%p828_p2)
}
   0x7   :  { %s832_s21 = scalar_lea.vmem %s17_s13, 4352  ;;  %p837_p4 = scmp.lt.s32.totalorder %s17_s13, %s17_s13 }
   0x8   :  { %p833_p3 = scmp.ne.s32.totalorder %s17_s13, %s832_s21  ;;  %p838_p5 = scmp.lt.s32.totalorder %s832_s21, %s832_s21 }
   0xa   :  { %p839_p6 = por %p838_p5, %p837_p4 }
   0xc   :  { %p840_p7 = pnand %p839_p6, %p833_p3 }
   0xe   :  { %843 = shalt.err (!%p840_p7)
}
   0xf   :  { %s847_s22 = smov 128   ;;  %s848_s23 = smov 8  }
  0x10   :  { %22 = dma.hbm_to_vmem [thread:$0]  %s975_s1, 4352, %s17_s13, [#allocation3], %s847_s22, %s847_s22, %s848_s23  }
  0x11   :  { %844 = dma.done.wait [#allocation3], 4352  }
  0x12   :  { %845 = vsyncadd [#allocation3], 4294962944  ;;  %vm43_vm0 = vcmask 130048   ;;  %v37_v0 = vld [vmem:[#allocation2] sm:$0xff]  ;;  %v38_v1 = vld [vmem:[#allocation2 + $0x8] sm:$0xff]  ;;  %v39_v56 = vlaneseq  ;;  %vm439_vm1 = vcmask 64512  }
  0x13   :  { %v28_v2 = vld [vmem:[%s974_s0] sm:$0xff]  ;;  %v719_v3 = vpack.c.bf16 %v38_v1, %v37_v0  ;;  %v181_v4 = vld [vmem:[#allocation2 + $0x10] sm:$0xff]  ;;  %v182_v5 = vld [vmem:[#allocation2 + $0x18] sm:$0xff] }
  0x14   :  { %619 = vmatprep.mubr.msk.f32.mxu0 %vm43_vm0, %v28_v2  ;;  %v29_v6 = vld [vmem:[%s974_s0 + $0x8] sm:$0xff]  ;;  %v723_v7 = vpack.c.bf16 %v182_v5, %v181_v4  ;;  %v183_v8 = vld [vmem:[#allocation2 + $0x20] sm:$0xff]  ;;  %v30_v10 = vld [vmem:[%s974_s0 + $0x10] sm:$0xff]  ;;  %v913_v57 = vshrl.u32 %v39_v56, 7 }
  0x15   :  { %720 = vmatprep.subr.bf16.mxu0 %v719_v3  ;;  %v184_v9 = vld [vmem:[#allocation2 + $0x28] sm:$0xff]  ;;  %v185_v12 = vld [vmem:[#allocation2 + $0x30] sm:$0xff]  ;;  %v186_v13 = vld [vmem:[#allocation2 + $0x38] sm:$0xff] }
  0x16   :  { %722 = vmatpush3.bf16.msra.mxu0 %v719_v3  ;;  %v727_v11 = vpack.c.bf16 %v184_v9, %v183_v8  ;;  %724 = vmatprep.subr.bf16.mxu1 %v723_v7  ;;  %v31_v14 = vld [vmem:[%s974_s0 + $0x18] sm:$0xff]  ;;  %v731_v15 = vpack.c.bf16 %v186_v13, %v185_v12  ;;  %v32_v16 = vld [vmem:[%s974_s0 + $0x20] sm:$0xff]  ;;  %v188_v18 = vld [vmem:[#allocation2 + $0x48] sm:$0xff]  ;;  %v41_v58 = vsub.s32 0, %v913_v57 }
  0x17   :  { %726 = vmatpush3.bf16.msra.mxu1 %v723_v7  ;;  %v187_v17 = vld [vmem:[#allocation2 + $0x40] sm:$0xff]  ;;  %v33_v19 = vld [vmem:[%s974_s0 + $0x28] sm:$0xff]  ;;  %v34_v21 = vld [vmem:[%s974_s0 + $0x30] sm:$0xff] }
  0x18   :  { %728 = vmatprep.subr.bf16.mxu1 %v727_v11  ;;  %v735_v20 = vpack.c.bf16 %v188_v18, %v187_v17  ;;  %v189_v22 = vld [vmem:[#allocation2 + $0x50] sm:$0xff]  ;;  %v190_v23 = vld [vmem:[#allocation2 + $0x58] sm:$0xff]  ;;  %v191_v26 = vld [vmem:[#allocation2 + $0x60] sm:$0xff] }
  0x19   :  { %620 = vmatmul.mubr.msk.f32.vlgmr.msra.gmra.mrb[0].mxu0 %vm43_vm0, %v29_v6  ;;  %v35_v24 = vld [vmem:[%s974_s0 + $0x38] sm:$0xff]  ;;  %v739_v25 = vpack.c.bf16 %v190_v23, %v189_v22  ;;  %v192_v27 = vld [vmem:[#allocation2 + $0x68] sm:$0xff]  ;;  %v193_v29 = vld [vmem:[#allocation2 + $0x70] sm:$0xff] }
  0x1a   :  { %622 = vmatprep.mubr.msk.f32.mxu0 %vm43_vm0, %v30_v10  ;;  %v743_v28 = vpack.c.bf16 %v192_v27, %v191_v26  ;;  %v194_v30 = vld [vmem:[#allocation2 + $0x78] sm:$0xff]  ;;  %v195_v32 = vld [vmem:[#allocation2 + $0x80] sm:$0xff]  ;;  %v196_v33 = vld [vmem:[#allocation2 + $0x88] sm:$0xff] }
  0x1b   :  { %730 = vmatpush3.bf16.msra.mxu1 %v727_v11  ;;  %v747_v31 = vpack.c.bf16 %v194_v30, %v193_v29  ;;  %v751_v34 = vpack.c.bf16 %v196_v33, %v195_v32  ;;  %v314_v35 = vld [vmem:[#allocation2 + $0x90] sm:$0xff]  ;;  %v315_v36 = vld [vmem:[#allocation2 + $0x98] sm:$0xff]  ;;  %v316_v37 = vld [vmem:[#allocation2 + $0xa0] sm:$0xff] }
  0x1c   :  { %732 = vmatprep.subr.bf16.mxu1 %v731_v15  ;;  %v755_v38 = vpack.c.bf16 %v315_v36, %v314_v35  ;;  %v317_v39 = vld [vmem:[#allocation2 + $0xa8] sm:$0xff]  ;;  %v318_v41 = vld [vmem:[#allocation2 + $0xb0] sm:$0xff]  ;;  %v319_v42 = vld [vmem:[#allocation2 + $0xb8] sm:$0xff] }
  0x1d   :  { %623 = vmatmul.mubr.msk.f32.gmra.mrb[2].mxu0 %vm43_vm0, %v31_v14  ;;  %v759_v40 = vpack.c.bf16 %v317_v39, %v316_v37  ;;  %v763_v43 = vpack.c.bf16 %v319_v42, %v318_v41  ;;  %v320_v44 = vld [vmem:[#allocation2 + $0xc0] sm:$0xff]  ;;  %v321_v45 = vld [vmem:[#allocation2 + $0xc8] sm:$0xff]  ;;  %v322_v47 = vld [vmem:[#allocation2 + $0xd0] sm:$0xff] }
  0x1e   :  { %625 = vmatprep.mubr.msk.f32.mxu0 %vm43_vm0, %v32_v16  ;;  %756 = vmatprep.subr.bf16.mxu0 %v755_v38  ;;  %v767_v46 = vpack.c.bf16 %v321_v45, %v320_v44  ;;  %v323_v48 = vld [vmem:[#allocation2 + $0xd8] sm:$0xff]  ;;  %v324_v50 = vld [vmem:[#allocation2 + $0xe0] sm:$0xff]  ;;  %v325_v51 = vld [vmem:[#allocation2 + $0xe8] sm:$0xff] }
  0x1f   :  { %734 = vmatpush3.bf16.msra.mxu1 %v731_v15  ;;  %758 = vmatpush3.bf16.msra.mxu0 %v755_v38  ;;  %v771_v49 = vpack.c.bf16 %v323_v48, %v322_v47  ;;  %v775_v52 = vpack.c.bf16 %v325_v51, %v324_v50  ;;  %v326_v53 = vld [vmem:[#allocation2 + $0xf0] sm:$0xff]  ;;  %v327_v54 = vld [vmem:[#allocation2 + $0xf8] sm:$0xff]  ;;  %v919_v59 = vld [vmem:[%s976_s2] sm:$0x7]  ;;  %v332_v50 = vsub.s32 2, %v913_v57 }
  0x20   :  { %736 = vmatprep.subr.bf16.mxu1 %v735_v20  ;;  %760 = vmatprep.subr.bf16.mxu0 %v759_v40  ;;  %v779_v55 = vpack.c.bf16 %v327_v54, %v326_v53  ;;  %v42_v60 = vrot.slane %v919_v59, %v41_v58  ;;  %v329_v22 = vld [vmem:[#allocation2 + $0x108] sm:$0xff] }
  0x21   :  { %626 = vmatmul.mubr.msk.f32.gmra.mrb[4].mxu0 %vm43_vm0, %v33_v19  ;;  %v333_v51 = vrot.slane %v919_v59, %v332_v50 }
  0x22   :  { %628 = vmatprep.mubr.msk.f32.mxu0 %vm43_vm0, %v34_v21  ;;  %v328_v21 = vld [vmem:[#allocation2 + $0x100] sm:$0xff] }
  0x23   :  { %738 = vmatpush3.bf16.msra.mxu1 %v735_v20  ;;  %762 = vmatpush3.bf16.msra.mxu0 %v759_v40  ;;  %v783_v23 = vpack.c.bf16 %v329_v22, %v328_v21 }
  0x24   :  { %740 = vmatprep.subr.bf16.mxu1 %v739_v25  ;;  %764 = vmatprep.subr.bf16.mxu0 %v763_v43 }
  0x25   :  { %629 = vmatmul.mubr.msk.f32.gmra.mrb[6].mxu0 %vm43_vm0, %v35_v24  ;;  %v199_v24 = vsub.s32 1, %v913_v57 }
  0x27   :  { %742 = vmatpush3.bf16.msra.mxu1 %v739_v25  ;;  %766 = vmatpush3.bf16.msra.mxu0 %v763_v43  ;;  %v200_v25 = vrot.slane %v919_v59, %v199_v24 }
  0x28   :  { %744 = vmatprep.subr.bf16.mxu1 %v743_v28  ;;  %768 = vmatprep.subr.bf16.mxu0 %v767_v46 }
  0x2b   :  { %746 = vmatpush3.bf16.msra.mxu1 %v743_v28  ;;  %770 = vmatpush3.bf16.msra.mxu0 %v767_v46 }
  0x2c   :  { %748 = vmatprep.subr.bf16.mxu1 %v747_v31  ;;  %772 = vmatprep.subr.bf16.mxu0 %v771_v49 }
  0x2f   :  { %750 = vmatpush3.bf16.msra.mxu1 %v747_v31  ;;  %774 = vmatpush3.bf16.msra.mxu0 %v771_v49 }
  0x30   :  { %752 = vmatprep.subr.bf16.mxu1 %v751_v34  ;;  %776 = vmatprep.subr.bf16.mxu0 %v775_v52 }
  0x33   :  { %754 = vmatpush3.bf16.msra.mxu1 %v751_v34  ;;  %778 = vmatpush3.bf16.msra.mxu0 %v775_v52 }
  0x34   :  { %780 = vmatprep.subr.bf16.mxu0 %v779_v55 }
  0x37   :  { %782 = vmatpush3.bf16.msra.mxu0 %v779_v55 }
  0x38   :  { %784 = vmatprep.subr.bf16.mxu0 %v783_v23 }
  0x3b   :  { %786 = vmatpush3.bf16.msra.mxu0 %v783_v23 }
  0xec   :  { %v621_v61 = vpop.f32.mrb[0].mxu0 }
  0xed   :  { %v140_v62 = vadd.f32 %v621_v61, %v42_v60  ;;  %v134_v63 = vpop.f32.mrb[1].mxu0 }
  0xee   :  { %v135_v0 = vadd.f32 %v134_v63, %v42_v60 }
  0xef   :  { %v174_v3 = vmax.f32 %v140_v62, 0.0 }
  0xf0   :  { %v624_v1 = vpop.f32.mrb[2].mxu0  ;;  %v173_v2 = vmax.f32 %v135_v0, 0.0 }
  0xf1   :  { %v150_v4 = vadd.f32 %v624_v1, %v42_v60  ;;  %v144_v5 = vpop.f32.mrb[3].mxu0 }
  0xf2   :  { %v145_v6 = vadd.f32 %v144_v5, %v42_v60  ;;  %663 = vmatprep.mubr.f32.mxu1 %v173_v2 }
  0xf3   :  { %664 = vmatmul.mubr.f32.vlgmr.msra.gmra.mrb[0].mxu1 %v174_v3  ;;  %v176_v9 = vmax.f32 %v150_v4, 0.0 }
  0xf4   :  { %v175_v7 = vmax.f32 %v145_v6, 0.0  ;;  %v627_v8 = vpop.f32.mrb[4].mxu0 }
  0xf5   :  { %v160_v10 = vadd.f32 %v627_v8, %v42_v60  ;;  %v154_v11 = vpop.f32.mrb[5].mxu0 }
  0xf6   :  { %v155_v12 = vadd.f32 %v154_v11, %v42_v60  ;;  %666 = vmatprep.mubr.f32.mxu1 %v175_v7 }
  0xf7   :  { %v178_v13 = vmax.f32 %v160_v10, 0.0  ;;  %667 = vmatmul.mubr.f32.gmra.mrb[2].mxu1 %v176_v9 }
  0xf8   :  { %v177_v14 = vmax.f32 %v155_v12, 0.0  ;;  %v630_v15 = vpop.f32.mrb[6].mxu0 }
  0xf9   :  { %v170_v16 = vadd.f32 %v630_v15, %v42_v60  ;;  %v164_v17 = vpop.f32.mrb[7].mxu0 }
  0xfa   :  { %v165_v18 = vadd.f32 %v164_v17, %v42_v60  ;;  %669 = vmatprep.mubr.f32.mxu1 %v177_v14 }
  0xfb   :  { %v180_v19 = vmax.f32 %v170_v16, 0.0  ;;  %670 = vmatmul.mubr.f32.gmra.mrb[4].mxu1 %v178_v13 }
  0xfc   :  { %v179_v20 = vmax.f32 %v165_v18, 0.0 }
  0xfe   :  { %672 = vmatprep.mubr.f32.mxu1 %v179_v20 }
  0xff   :  { %673 = vmatmul.mubr.f32.gmra.mrb[6].mxu1 %v180_v19 }
 0x1c6   :  { %v665_v26 = vpop.f32.mrb[0].mxu1 }
 0x1c7   :  { %v273_v27 = vadd.f32 %v665_v26, %v200_v25  ;;  %v267_v28 = vpop.f32.mrb[1].mxu1 }
 0x1c8   :  { %v268_v29 = vadd.f32 %v267_v28, %v200_v25 }
 0x1c9   :  { %v307_v32 = vmax.f32 %v273_v27, 0.0 }
 0x1ca   :  { %v306_v30 = vmax.f32 %v268_v29, 0.0  ;;  %v668_v31 = vpop.f32.mrb[2].mxu1 }
 0x1cb   :  { %v283_v33 = vadd.f32 %v668_v31, %v200_v25  ;;  %v277_v34 = vpop.f32.mrb[3].mxu1 }
 0x1cc   :  { %v278_v35 = vadd.f32 %v277_v34, %v200_v25  ;;  %707 = vmatprep.mubr.f32.mxu0 %v306_v30 }
 0x1cd   :  { %708 = vmatmul.mubr.f32.vlgmr.msra.gmra.mrb[8].mxu0 %v307_v32  ;;  %v309_v38 = vmax.f32 %v283_v33, 0.0 }
 0x1ce   :  { %v308_v36 = vmax.f32 %v278_v35, 0.0  ;;  %v671_v37 = vpop.f32.mrb[4].mxu1 }
 0x1cf   :  { %v293_v39 = vadd.f32 %v671_v37, %v200_v25  ;;  %v287_v40 = vpop.f32.mrb[5].mxu1 }
 0x1d0   :  { %v288_v41 = vadd.f32 %v287_v40, %v200_v25  ;;  %710 = vmatprep.mubr.f32.mxu0 %v308_v36 }
 0x1d1   :  { %v311_v42 = vmax.f32 %v293_v39, 0.0  ;;  %711 = vmatmul.mubr.f32.gmra.mrb[10].mxu0 %v309_v38 }
 0x1d2   :  { %v310_v43 = vmax.f32 %v288_v41, 0.0  ;;  %v674_v44 = vpop.f32.mrb[6].mxu1 }
 0x1d3   :  { %v303_v45 = vadd.f32 %v674_v44, %v200_v25  ;;  %v297_v46 = vpop.f32.mrb[7].mxu1 }
 0x1d4   :  { %v298_v47 = vadd.f32 %v297_v46, %v200_v25  ;;  %713 = vmatprep.mubr.f32.mxu0 %v310_v43 }
 0x1d5   :  { %v313_v48 = vmax.f32 %v303_v45, 0.0  ;;  %714 = vmatmul.mubr.f32.gmra.mrb[12].mxu0 %v311_v42 }
 0x1d6   :  { %v312_v49 = vmax.f32 %v298_v47, 0.0 }
 0x1d8   :  { %716 = vmatprep.mubr.f32.mxu0 %v312_v49 }
 0x1d9   :  { %717 = vmatmul.mubr.f32.gmra.mrb[14].mxu0 %v313_v48 }
 0x2a0   :  { %v709_v52 = vpop.f32.mrb[8].mxu0 }
 0x2a1   :  { %v406_v53 = vadd.f32 %v709_v52, %v333_v51  ;;  %v400_v54 = vpop.f32.mrb[9].mxu0 }
 0x2a2   :  { %v401_v55 = vadd.f32 %v400_v54, %v333_v51 }
 0x2a3   :  { %v443_v56 = vsel %vm439_vm1, %v406_v53, -inf }
 0x2a4   :  { %444 = vmax.xlane.f32.xlu0 %v443_v56  ;;  %v712_v58 = vpop.f32.mrb[10].mxu0  ;;  %v440_v0 = vsel %vm439_vm1, %v401_v55, -inf }
 0x2a5   :  { %v416_v60 = vadd.f32 %v712_v58, %v333_v51  ;;  %v410_v61 = vpop.f32.mrb[11].mxu0 }
 0x2a6   :  { %v411_v62 = vadd.f32 %v410_v61, %v333_v51 }
 0x2a7   :  { %v449_v63 = vsel %vm439_vm1, %v416_v60, -inf }
 0x2a8   :  { %450 = vmax.xlane.f32.xlu1 %v449_v63  ;;  %v715_v57 = vpop.f32.mrb[12].mxu0  ;;  %441 = vmax.xlane.f32.xlu0 %v440_v0  ;;  %v446_v3 = vsel %vm439_vm1, %v411_v62, -inf }
 0x2a9   :  { %v420_v59 = vpop.f32.mrb[13].mxu0  ;;  %v426_v2 = vadd.f32 %v715_v57, %v333_v51 }
 0x2aa   :  { %v421_v1 = vadd.f32 %v420_v59, %v333_v51 }
 0x2ab   :  { %v455_v9 = vsel %vm439_vm1, %v426_v2, -inf }
 0x2ac   :  { %v718_v4 = vpop.f32.mrb[14].mxu0  ;;  %447 = vmax.xlane.f32.xlu1 %v446_v3  ;;  %v452_v5 = vsel %vm439_vm1, %v421_v1, -inf }
 0x2ad   :  { %v430_v6 = vpop.f32.mrb[15].mxu0  ;;  %453 = vmax.xlane.f32.xlu0 %v452_v5  ;;  %v436_v8 = vadd.f32 %v718_v4, %v333_v51 }
 0x2ae   :  { %v431_v7 = vadd.f32 %v430_v6, %v333_v51 }
 0x2af   :  { %v461_v11 = vsel %vm439_vm1, %v436_v8, -inf }
 0x2b0   :  { %456 = vmax.xlane.f32.xlu1 %v455_v9  ;;  %v458_v10 = vsel %vm439_vm1, %v431_v7, -inf }
 0x2b1   :  { %459 = vmax.xlane.f32.xlu0 %v458_v10 }
 0x2b4   :  { %462 = vmax.xlane.f32.xlu1 %v461_v11 }
 0x331   :  { %v445_v12 = vpop.xlane.xlu0 %444 }
 0x332   :  { %v465_v13 = vsub.f32 %v406_v53, %v445_v12 }
 0x334   :  { %v474_v14 = vmul.f32 1.442695, %v465_v13 }
 0x335   :  { %v451_v15 = vpop.xlane.xlu1 %450  ;;  %v442_v16 = vpop.xlane.xlu0 %441 }
 0x336   :  { %790 = vpow2.f32 %v474_v14  ;;  %v467_v17 = vsub.f32 %v416_v60, %v451_v15  ;;  %v464_v18 = vsub.f32 %v401_v55, %v442_v16 }
 0x338   :  { %v478_v19 = vmul.f32 1.442695, %v467_v17  ;;  %v472_v20 = vmul.f32 1.442695, %v464_v18 }
 0x339   :  { %v448_v21 = vpop.xlane.xlu1 %447 }
 0x33a   :  { %792 = vpow2.f32 %v478_v19  ;;  %v466_v22 = vsub.f32 %v411_v62, %v448_v21  ;;  %v454_v23 = vpop.xlane.xlu0 %453 }
 0x33b   :  { %794 = vpow2.f32 %v472_v20  ;;  %v468_v24 = vsub.f32 %v421_v1, %v454_v23 }
 0x33c   :  { %v476_v25 = vmul.f32 1.442695, %v466_v22 }
 0x33d   :  { %v480_v26 = vmul.f32 1.442695, %v468_v24  ;;  %v457_v27 = vpop.xlane.xlu1 %456 }
 0x33e   :  { %796 = vpow2.f32 %v476_v25  ;;  %v469_v28 = vsub.f32 %v426_v2, %v457_v27  ;;  %v460_v29 = vpop.xlane.xlu0 %459 }
 0x33f   :  { %v470_v30 = vsub.f32 %v431_v7, %v460_v29  ;;  %798 = vpow2.f32 %v480_v26 }
 0x340   :  { %v791_v31 = vpop.eup %790  ;;  %v482_v32 = vmul.f32 1.442695, %v469_v28 }
 0x341   :  { %v484_v33 = vmul.f32 1.442695, %v470_v30  ;;  %v463_v34 = vpop.xlane.xlu1 %462  ;;  %v491_v35 = vsel %vm439_vm1, %v791_v31, 0.0 }
 0x342   :  { %800 = vpow2.f32 %v482_v32  ;;  %v471_v36 = vsub.f32 %v436_v8, %v463_v34  ;;  %492 = vadd.xlane.f32.xlu1 %v491_v35 }
 0x343   :  { %802 = vpow2.f32 %v484_v33 }
 0x344   :  { %v793_v37 = vpop.eup %792  ;;  %v486_v38 = vmul.f32 1.442695, %v471_v36 }
 0x345   :  { %v795_v39 = vpop.eup %794  ;;  %v497_v40 = vsel %vm439_vm1, %v793_v37, 0.0 }
 0x346   :  { %804 = vpow2.f32 %v486_v38  ;;  %498 = vadd.xlane.f32.xlu1 %v497_v40  ;;  %v488_v41 = vsel %vm439_vm1, %v795_v39, 0.0 }
 0x347   :  { %489 = vadd.xlane.f32.xlu0 %v488_v41 }
 0x348   :  { %v797_v42 = vpop.eup %796 }
 0x349   :  { %v494_v43 = vsel %vm439_vm1, %v797_v42, 0.0  ;;  %v799_v44 = vpop.eup %798 }
 0x34a   :  { %v500_v47 = vsel %vm439_vm1, %v799_v44, 0.0 }
 0x34b   :  { %495 = vadd.xlane.f32.xlu0 %v494_v43 }
 0x34c   :  { %v801_v45 = vpop.eup %800 }
 0x34d   :  { %v503_v46 = vsel %vm439_vm1, %v801_v45, 0.0  ;;  %v803_v48 = vpop.eup %802 }
 0x34e   :  { %504 = vadd.xlane.f32.xlu1 %v503_v46  ;;  %v506_v51 = vsel %vm439_vm1, %v803_v48, 0.0 }
 0x34f   :  { %501 = vadd.xlane.f32.xlu0 %v500_v47 }
 0x350   :  { %v805_v49 = vpop.eup %804 }
 0x351   :  { %v509_v50 = vsel %vm439_vm1, %v805_v49, 0.0 }
 0x352   :  { %510 = vadd.xlane.f32.xlu1 %v509_v50 }
 0x353   :  { %507 = vadd.xlane.f32.xlu0 %v506_v51 }
 0x3cf   :  { %v493_v52 = vpop.xlane.xlu1 %492 }
 0x3d0   :  { %806 = vrcp.f32 %v493_v52 }
 0x3d3   :  { %v499_v53 = vpop.xlane.xlu1 %498 }
 0x3d4   :  { %808 = vrcp.f32 %v499_v53  ;;  %v490_v54 = vpop.xlane.xlu0 %489 }
 0x3d5   :  { %810 = vrcp.f32 %v490_v54 }
 0x3d8   :  { %v496_v55 = vpop.xlane.xlu0 %495 }
 0x3d9   :  { %812 = vrcp.f32 %v496_v55 }
 0x3da   :  { %v807_v56 = vpop.eup %806 }
 0x3db   :  { %v529_v58 = vmul.f32 %v807_v56, %v791_v31  ;;  %v505_v60 = vpop.xlane.xlu1 %504 }
 0x3dc   :  { %814 = vrcp.f32 %v505_v60  ;;  %v502_v61 = vpop.xlane.xlu0 %501 }
 0x3dd   :  { %537 = vst.msk [vmem:[%s977_s3 + $0x8] sm:$0xff] %vm439_vm1, %v529_v58  ;;  %816 = vrcp.f32 %v502_v61 }
 0x3de   :  { %v809_v62 = vpop.eup %808 }
 0x3df   :  { %v811_v63 = vpop.eup %810  ;;  %v531_v0 = vmul.f32 %v809_v62, %v793_v37  ;;  %v511_v57 = vpop.xlane.xlu1 %510 }
 0x3e0   :  { %v528_v59 = vmul.f32 %v811_v63, %v795_v39  ;;  %818 = vrcp.f32 %v511_v57  ;;  %v508_v1 = vpop.xlane.xlu0 %507 }
 0x3e1   :  { %539 = vst.msk [vmem:[%s977_s3 + $0x18] sm:$0xff] %vm439_vm1, %v531_v0  ;;  %820 = vrcp.f32 %v508_v1 }
 0x3e2   :  { %536 = vst.msk [vmem:[%s977_s3] sm:$0xff] %vm439_vm1, %v528_v59 }
 0x3e3   :  { %v813_v2 = vpop.eup %812 }
 0x3e4   :  { %v530_v3 = vmul.f32 %v813_v2, %v797_v42 }
 0x3e6   :  { %v815_v4 = vpop.eup %814  ;;  %538 = vst.msk [vmem:[%s977_s3 + $0x10] sm:$0xff] %vm439_vm1, %v530_v3 }
 0x3e7   :  { %v817_v5 = vpop.eup %816  ;;  %v533_v6 = vmul.f32 %v815_v4, %v801_v45 }
 0x3e8   :  { %v532_v7 = vmul.f32 %v817_v5, %v799_v44 }
 0x3e9   :  { %541 = vst.msk [vmem:[%s977_s3 + $0x28] sm:$0xff] %vm439_vm1, %v533_v6 }
 0x3ea   :  { %v819_v8 = vpop.eup %818  ;;  %540 = vst.msk [vmem:[%s977_s3 + $0x20] sm:$0xff] %vm439_vm1, %v532_v7 }
 0x3eb   :  { %v821_v9 = vpop.eup %820  ;;  %v535_v10 = vmul.f32 %v819_v8, %v805_v49 }
 0x3ec   :  { %v534_v11 = vmul.f32 %v821_v9, %v803_v48 }
 0x3ed   :  { %543 = vst.msk [vmem:[%s977_s3 + $0x38] sm:$0xff] %vm439_vm1, %v535_v10 }
 0x3ee   :  { %542 = vst.msk [vmem:[%s977_s3 + $0x30] sm:$0xff] %vm439_vm1, %v534_v11 }
 0x3ef   :  { %548 = vsyncpa [#allocation3], 1 }

</bundles_post_ra>
